<compile_context>
chip_gen: v5e
topology: v5e:2x2
jax: 0.10.0
libtpu: 0.0.40
codegen_flags: <defaults>
</compile_context>

<pallas_src>
import functools

import jax
import jax.numpy as jnp
from jax import lax
from jax.experimental import pallas as pl
from jax.experimental.pallas import tpu as pltpu


def _gauss_weights3(sigma):
    """1-D Gaussian taps for kernel_size=3 at offsets {-1, 0, +1}, normalized.
    Matches torchvision's _get_gaussian_kernel1d. Returns f32 (2,) = [center, edge]."""
    sigma = jnp.asarray(sigma, jnp.float32)
    e = jnp.exp(-0.5 / (sigma * sigma))        # unnormalized weight at |offset|==1
    norm = 1.0 + 2.0 * e
    return jnp.stack([1.0 / norm, e / norm]).astype(jnp.float32)


def _blur_pass(a, axis, size, wc, we):
    """One separable 3-tap Gaussian pass along `axis` with reflect boundaries.

    Interior neighbor sum a[i-1]+a[i+1] comes from two XLU rolls (summing both
    wrapped rolls makes the result independent of the roll direction convention);
    the two boundary rows/cols are patched with the reflected value (no edge
    repeat): neighbors of index 0 are both a[1], of index size-1 both a[size-2].
    """
    nb = pltpu.roll(a, 1, axis) + pltpu.roll(a, size - 1, axis)
    idx = lax.broadcasted_iota(jnp.int32, a.shape, axis)
    nb = jnp.where(idx == 0,
                   2.0 * lax.slice_in_dim(a, 1, 2, axis=axis), nb)
    nb = jnp.where(idx == size - 1,
                   2.0 * lax.slice_in_dim(a, size - 2, size - 1, axis=axis), nb)
    return wc * a + we * nb


def _blur_kernel(w_ref, x_ref, o_ref):
    """w_ref: SMEM f32 (2,) = [center, edge] taps; x_ref/o_ref: (1,1,H,W) VMEM block."""
    _, _, H, W = x_ref.shape
    x = x_ref[0, 0].astype(jnp.float32)          # (H, W)
    wc = w_ref[0]
    we = w_ref[1]
    v = _blur_pass(x, 0, H, wc, we)              # vertical  (sublane) pass
    o = _blur_pass(v, 1, W, wc, we)              # horizontal (lane)   pass
    o_ref[0, 0] = o.astype(o_ref.dtype)


def gaussian_blur3(x, sigma):
    """3x3 Gaussian blur with reflect padding of an NCHW tensor; one Pallas grid
    step per (n, c) image, both grid axes parallel (megacore + pipelining)."""
    N, C, H, W = x.shape
    weights = _gauss_weights3(sigma)
    img_spec = pl.BlockSpec((1, 1, H, W), lambda n, c: (n, c, 0, 0))
    return pl.pallas_call(
        _blur_kernel,
        out_shape=jax.ShapeDtypeStruct((N, C, H, W), x.dtype),
        grid=(N, C),
        in_specs=[
            pl.BlockSpec(memory_space=pltpu.MemorySpace.SMEM),   # runtime taps
            img_spec,
        ],
        out_specs=img_spec,
        compiler_params=pltpu.CompilerParams(
            dimension_semantics=("parallel", "parallel")),
    )(weights, x)


@functools.partial(jax.jit, static_argnames=("p",))
def random_gaussian_blur(img, key, p=0.5):
    """Forward pass of RandomGaussianBlur: with probability p apply
    GaussianBlur(kernel_size=3, sigma ~ U(0.1, 2.0)); otherwise return img
    unchanged. The Pallas kernel only runs on the blur branch."""
    k_coin, k_sigma = jax.random.split(key)
    apply_blur = jax.random.uniform(k_coin, ()) < p
    sigma = jax.random.uniform(k_sigma, (), minval=0.1, maxval=2.0)
    return lax.cond(apply_blur,
                    lambda im: gaussian_blur3(im, sigma),
                    lambda im: im,
                    img)


if __name__ == "__main__":
    key = jax.random.PRNGKey(0)
    k_img, k_aug = jax.random.split(key)

    x = jax.random.normal(k_img, (2, 4, 16, 16), dtype=jnp.float32)
    N, C, H, W = x.shape

    # 1) Deterministic blur path: run the kernel once and check it against a
    #    dense 9-tap reference with reflect padding (== torchvision gaussian_blur).
    sigma = jnp.float32(1.05)
    y = gaussian_blur3(x, sigma)
    jax.block_until_ready(y)

    wc, we = _gauss_weights3(sigma)
    g = jnp.stack([we, wc, we])
    xpad = jnp.pad(x, ((0, 0), (0, 0), (1, 1), (1, 1)), mode="reflect")
    ref = jnp.zeros_like(x)
    for dy in range(3):
        for dx in range(3):
            ref = ref + g[dy] * g[dx] * xpad[:, :, dy:dy + H, dx:dx + W]
    assert y.shape == x.shape and y.dtype == x.dtype
    max_err = float(jnp.max(jnp.abs(y - ref)))
    assert max_err < 1e-4, f"blur mismatch vs reference: {max_err}"

    # 2) Full module semantics: coin flip + sigma sampling inside the wrapper.
    out = random_gaussian_blur(x, k_aug, p=0.5)
    jax.block_until_ready(out)
    assert out.shape == x.shape and out.dtype == x.dtype

    print("KERNEL_OK")
</pallas_src>

<mosaic_0001>
module attributes {stable_mosaic.version = 11 : i64} {
  func.func @_blur_kernel(%arg0: i32, %arg1: i32, %arg2: memref<2xf32, #tpu.memory_space<smem>>, %arg3: memref<1x1x16x16xf32, #tpu.memory_space<vmem>>, %arg4: memref<1x1x16x16xf32, #tpu.memory_space<vmem>>) attributes {dimension_semantics = [#tpu.dimension_semantics<parallel>, #tpu.dimension_semantics<parallel>], iteration_bounds = array<i64: 2, 4>, scalar_prefetch = 0 : i64, scratch_operands = 0 : i64, tpu.core_type = #tpu.core_type<tc>, window_params = [{transform_indices = @transform_0, window_bounds = array<i64: 2>}, {transform_indices = @transform_1, window_bounds = array<i64: 1, 1, 16, 16>}, {transform_indices = @transform_2, window_bounds = array<i64: 1, 1, 16, 16>}]} {
    %c0 = arith.constant 0 : index
    %c0_0 = arith.constant 0 : index
    %c0_1 = arith.constant 0 : index
    %c0_2 = arith.constant 0 : index
    %0 = vector.load %arg3[%c0, %c0_0, %c0_1, %c0_2] : memref<1x1x16x16xf32, #tpu.memory_space<vmem>>, vector<1x1x16x16xf32>
    %1 = vector.shape_cast %0 : vector<1x1x16x16xf32> to vector<16x16xf32>
    %c0_3 = arith.constant 0 : index
    %2 = memref.load %arg2[%c0_3] : memref<2xf32, #tpu.memory_space<smem>>
    %c1 = arith.constant 1 : index
    %3 = memref.load %arg2[%c1] : memref<2xf32, #tpu.memory_space<smem>>
    %c1_i32 = arith.constant 1 : i32
    %4 = tpu.dynamic_rotate %1 by %c1_i32 dim 0 : vector<16x16xf32>, i32 -> vector<16x16xf32>
    %c15_i32 = arith.constant 15 : i32
    %5 = tpu.dynamic_rotate %1 by %c15_i32 dim 0 : vector<16x16xf32>, i32 -> vector<16x16xf32>
    %6 = arith.addf %4, %5 : vector<16x16xf32>
    %7 = tpu.iota {dimensions = array<i32: 0>} : vector<16x16xi32>
    %c0_i32 = arith.constant 0 : i32
    %8 = vector.broadcast %c0_i32 : i32 to vector<16x16xi32>
    %9 = arith.cmpi eq, %7, %8 : vector<16x16xi32>
    %10 = vector.extract_strided_slice %1 {offsets = [1, 0], sizes = [1, 16], strides = [1, 1]} : vector<16x16xf32> to vector<1x16xf32>
    %cst = arith.constant 2.000000e+00 : f32
    %11 = vector.broadcast %cst : f32 to vector<1x16xf32>
    %12 = arith.mulf %11, %10 : vector<1x16xf32>
    %13 = vector.shape_cast %12 : vector<1x16xf32> to vector<1x16xf32>
    %14 = vector.broadcast %13 : vector<1x16xf32> to vector<16x16xf32>
    %15 = arith.select %9, %14, %6 : vector<16x16xi1>, vector<16x16xf32>
    %c15_i32_4 = arith.constant 15 : i32
    %16 = vector.broadcast %c15_i32_4 : i32 to vector<16x16xi32>
    %17 = arith.cmpi eq, %7, %16 : vector<16x16xi32>
    %18 = vector.extract_strided_slice %1 {offsets = [14, 0], sizes = [1, 16], strides = [1, 1]} : vector<16x16xf32> to vector<1x16xf32>
    %cst_5 = arith.constant 2.000000e+00 : f32
    %19 = vector.broadcast %cst_5 : f32 to vector<1x16xf32>
    %20 = arith.mulf %19, %18 : vector<1x16xf32>
    %21 = vector.shape_cast %20 : vector<1x16xf32> to vector<1x16xf32>
    %22 = vector.broadcast %21 : vector<1x16xf32> to vector<16x16xf32>
    %23 = arith.select %17, %22, %15 : vector<16x16xi1>, vector<16x16xf32>
    %24 = vector.broadcast %2 : f32 to vector<16x16xf32>
    %25 = arith.mulf %24, %1 : vector<16x16xf32>
    %26 = vector.broadcast %3 : f32 to vector<16x16xf32>
    %27 = arith.mulf %26, %23 : vector<16x16xf32>
    %28 = arith.addf %25, %27 : vector<16x16xf32>
    %c1_i32_6 = arith.constant 1 : i32
    %29 = tpu.dynamic_rotate %28 by %c1_i32_6 dim 1 : vector<16x16xf32>, i32 -> vector<16x16xf32>
    %c15_i32_7 = arith.constant 15 : i32
    %30 = tpu.dynamic_rotate %28 by %c15_i32_7 dim 1 : vector<16x16xf32>, i32 -> vector<16x16xf32>
    %31 = arith.addf %29, %30 : vector<16x16xf32>
    %32 = tpu.iota {dimensions = array<i32: 1>} : vector<16x16xi32>
    %c0_i32_8 = arith.constant 0 : i32
    %33 = vector.broadcast %c0_i32_8 : i32 to vector<16x16xi32>
    %34 = arith.cmpi eq, %32, %33 : vector<16x16xi32>
    %35 = vector.extract_strided_slice %28 {offsets = [0, 1], sizes = [16, 1], strides = [1, 1]} : vector<16x16xf32> to vector<16x1xf32>
    %cst_9 = arith.constant 2.000000e+00 : f32
    %36 = vector.broadcast %cst_9 : f32 to vector<16x1xf32>
    %37 = arith.mulf %36, %35 : vector<16x1xf32>
    %38 = vector.shape_cast %37 : vector<16x1xf32> to vector<16x1xf32>
    %39 = vector.broadcast %38 : vector<16x1xf32> to vector<16x16xf32>
    %40 = arith.select %34, %39, %31 : vector<16x16xi1>, vector<16x16xf32>
    %c15_i32_10 = arith.constant 15 : i32
    %41 = vector.broadcast %c15_i32_10 : i32 to vector<16x16xi32>
    %42 = arith.cmpi eq, %32, %41 : vector<16x16xi32>
    %43 = vector.extract_strided_slice %28 {offsets = [0, 14], sizes = [16, 1], strides = [1, 1]} : vector<16x16xf32> to vector<16x1xf32>
    %cst_11 = arith.constant 2.000000e+00 : f32
    %44 = vector.broadcast %cst_11 : f32 to vector<16x1xf32>
    %45 = arith.mulf %44, %43 : vector<16x1xf32>
    %46 = vector.shape_cast %45 : vector<16x1xf32> to vector<16x1xf32>
    %47 = vector.broadcast %46 : vector<16x1xf32> to vector<16x16xf32>
    %48 = arith.select %42, %47, %40 : vector<16x16xi1>, vector<16x16xf32>
    %49 = vector.broadcast %2 : f32 to vector<16x16xf32>
    %50 = arith.mulf %49, %28 : vector<16x16xf32>
    %51 = vector.broadcast %3 : f32 to vector<16x16xf32>
    %52 = arith.mulf %51, %48 : vector<16x16xf32>
    %53 = arith.addf %50, %52 : vector<16x16xf32>
    %c0_12 = arith.constant 0 : index
    %c0_13 = arith.constant 0 : index
    %c0_14 = arith.constant 0 : index
    %c0_15 = arith.constant 0 : index
    %54 = vector.load %arg4[%c0_12, %c0_13, %c0_14, %c0_15] : memref<1x1x16x16xf32, #tpu.memory_space<vmem>>, vector<1x1x16x16xf32>
    %55 = vector.shape_cast %54 : vector<1x1x16x16xf32> to vector<16x16xf32>
    %56 = vector.shape_cast %53 : vector<16x16xf32> to vector<1x1x16x16xf32>
    tpu.vector_store %arg4[%c0_12, %c0_13, %c0_14, %c0_15], %56 {strides = array<i32>} : memref<1x1x16x16xf32, #tpu.memory_space<vmem>>, vector<1x1x16x16xf32>,
    return
  }
  func.func @transform_0(%arg0: i32, %arg1: i32) -> i32 {
    %c0_i32 = arith.constant 0 : i32
    %c0_i32_0 = arith.constant 0 : i32
    return %c0_i32 : i32
  }
  func.func @transform_1(%arg0: i32, %arg1: i32) -> (i32, i32, i32, i32) {
    %c0_i32 = arith.constant 0 : i32
    %c0_i32_0 = arith.constant 0 : i32
    %c0_i32_1 = arith.constant 0 : i32
    return %arg0, %arg1, %c0_i32, %c0_i32_0 : i32, i32, i32, i32
  }
  func.func @transform_2(%arg0: i32, %arg1: i32) -> (i32, i32, i32, i32) {
    %c0_i32 = arith.constant 0 : i32
    %c0_i32_0 = arith.constant 0 : i32
    %c0_i32_1 = arith.constant 0 : i32
    return %arg0, %arg1, %c0_i32, %c0_i32_0 : i32, i32, i32, i32
  }
}

</mosaic_0001>

<bundles_post_ra>
// kernel: tpu_custom_call.1
= control target key start
LH: loop header
LB: loop body
LE: loop exit
PB: predicated region body
PF: predicated region fallthrough
CT: control target
= control target key end

     0   :  { %s914_s0 = inlined_call_operand.hbm [shape: f32[2], index: 0, kind: input, shape index: {}]   ;;  %s915_s1 = inlined_call_operand.hbm [shape: f32[2,4,16,16], index: 1, kind: input, shape index: {}]   ;;  %s916_s2 = inlined_call_operand.hbm [shape: f32[2,4,16,16], index: 2, kind: output, shape index: {}]  }
   0x1   :  { %926 = sst [smem:[#allocation17_spill]] %s914_s0 }
   0x2   :  { %927 = sst [smem:[#allocation18_spill]] %s916_s2 }
   0x3   :  { %7 = vsyncpa [#allocation5], 0 }
   0x4   :  { %8 = vsyncpa [#allocation3], 0 }
   0x5   :  { %10 = vsyncpa [#allocation3 + $0x1], 0 }
   0x6   :  { %11 = vsyncpa [#allocation4], 0 }
   0x7   :  { %13 = vsyncpa [#allocation4 + $0x1], 0  ;;  %s719_s9 = smov 0   ;;  %s721_s10 = smov 0  }
   0x8   :  { %s723_s11 = smov 0   ;;  %s725_s12 = smov 0  }
   0x9   :  { %s727_s13 = smov 0   ;;  %s729_s14 = smov 0  }
   0xa   :  { %s731_s15 = smov 0   ;;  %s733_s16 = smov 0  }
   0xb LB: > { %928 = sst [smem:[#allocation11_spill]] %s664_s9  ;;  %s423_s17 = sadd.s32 4294967295, %s692_s16   ;;  %s692_s16 = sphi %s733_s16, %s19_s16   ;;  %s688_s15 = sphi %s731_s15, %s954_s15   ;;  %s684_s14 = sphi %s729_s14, %s949_s14   ;;  %s680_s13 = sphi %s727_s13, %s953_s13   ;;  %s676_s12 = sphi %s725_s12, %s948_s12   ;;  %s672_s11 = sphi %s723_s11, %s952_s11   ;;  %s668_s10 = sphi %s721_s10, %s951_s10   ;;  %s664_s9 = sphi %s719_s9, %s950_s9  }
   0xc   : > { %929 = sst [smem:[#allocation12_spill]] %s684_s14  ;;  %s424_s18 = sadd.s32 4294967294, %s692_s16  }
   0xd   : > { %930 = sst [smem:[#allocation13_spill]] %s692_s16  ;;  %p68_p0 = scmp.ne.s32.totalorder %s672_s11, %s668_s10 }
   0xe   : > { %p69_p1 = scmp.eq.s32.totalorder %s692_s16, 0  ;;  %p74_p2 = scmp.ne.s32.totalorder %s668_s10, %s664_s9 }
   0xf   : > { %p767_p3 = scmp.eq.s32.totalorder %s423_s17, 0  ;;  %p100_p4 = scmp.eq.s32.totalorder %s423_s17, 7 }
  0x10   : > { %p70_p5 = por %p69_p1, %p68_p0  ;;  %p106_p6 = scmp.eq.s32.totalorder %s424_s18, 7 }
  0x11   : > { %p773_p7 = por %p767_p3, %p74_p2  ;;  %p777_p8 = por %p100_p4, %p68_p0 }
  0x12   : > { %p781_p9 = por %p106_p6, %p74_p2  ;;  %p425_p10 = scmp.ge.s32.totalorder %s692_s16, 1 }
  0x13   : > { %s933_s22 = scalar_select %p777_p8, 1, 0 }
  0x14   : > { %s935_s23 = scalar_select %p781_p9, 1, 0 }
  0x15   : > { %934 = sst [smem:[#allocation14_spill]] %s933_s22  ;;  %p113_p11 = scmp.lt.s32.totalorder %s692_s16, 9 }
  0x16   : > { %936 = sst [smem:[#allocation15_spill]] %s935_s23  ;;  %p464_p13 = scmp.lt.s32.totalorder %s692_s16, 8 }
  0x17   : > { %s937_s0 = sld [smem:[#allocation17_spill]]  ;;  %p790_p12 = pnand %p425_p10, %p113_p11 }
  0x18   : > { %p797_p1 = pnand %p464_p13, %p70_p5  ;;  %s28_s29 = sadd.s32 1, %s684_s14 }
  0x19   : > { %p451_p0 = pneg %p790_p12  ;;  %s694_s30 = smov [#allocation2]  }
  0x1a   : > { %p29_p4 = scmp.ge.s32.totalorder %s28_s29, 4  ;;  %s31_s3 = sadd.s32 1, %s688_s15 }
  0x1b   : > { %p452_p2 = pnand %p451_p0, %p767_p3  ;;  %s136_s4 = sand.u32 1, %s672_s11  }
  0x1c   : > { %s429_s5 = sshll.u32 %s684_s14, 1  ;;  %s956_s29 = smov (%p29_p4, %s28_s29), 0 }
  0x1d   : > { %s125_s26 = sshll.u32 %s937_s0, 4  ;;  %940 = sst [smem:[#allocation16_spill]] %s956_s29  ;;  %s126_s26 = int_to_ptr.hbm [resolvable:$true] %s125_s26 }
  0x1e   : > { %454 = dma.hbm_to_smem (!%p452_p2), %s126_s26, 16, %s694_s30, [#allocation5]  }
  0x1f   : > { %s958_s3 = smov (!%p29_p4, %s31_s3), %s688_s15  ;;  %s57_s6 = ssub.s32 %s684_s14, %s956_s29 }
  0x20   : > { %p33_p5 = scmp.ge.s32.totalorder %s958_s3, 2  ;;  %s428_s7 = sshll.u32 %s136_s4, 4 }
  0x21   : > { %s430_s8 = sshll.u32 %s688_s15, 3  ;;  %s140_s18 = scalar_lea.vmem [#allocation6], %s428_s7 }
  0x22   : > { %s960_s3 = smov (%p33_p5, %s958_s3), 0  ;;  %s145_s17 = sadd.s32 %s430_s8, %s429_s5 }
  0x23   : > { %s150_s24 = sshll.u32 %s140_s18, 4  ;;  %s56_s25 = ssub.s32 %s688_s15, %s960_s3  ;;  %s151_s24 = int_to_ptr.vmem [resolvable:$true] %s150_s24 }
  0x24   : > { %s431_s26 = sshll.u32 %s145_s17, 3  ;;  %s58_s30 = sor.u32 %s57_s6, %s56_s25 }
  0x25   : > { %s147_s23 = scalar_lea.hbm %s915_s1, %s431_s26  ;;  %p59_p6 = scmp.eq.s32.totalorder %s58_s30, 0 }
  0x26   : > { %s148_s29 = sshll.u32 %s147_s23, 4  ;;  %s941_s14 = sadd.s32 1, %s672_s11  ;;  %s149_s29 = int_to_ptr.hbm [resolvable:$true] %s148_s29 }
  0x27   : > { %s823_s9 = scalar_select %p59_p6, %s672_s11, %s941_s14  }
  0x28   : > { %s137_s16 = scalar_lea.sflag [#allocation3], %s136_s4  ;;  %s695_s22 = smov 128  }
  0x29   : > { %s696_s2 = smov 8   ;;  %162 = sbr.rel (%p790_p12) target bundleno = 524 (0x20c), region = 28 }
  0x2a   : > { %458 = dma.hbm_to_vmem [thread:$0]  (!%p797_p1), %s149_s29, 256, %s151_s24, %s137_s16, %s695_s22, %s695_s22, %s696_s2  }
  0x2e   : > { %651 = dma.done.wait (%p767_p3), [#allocation5], 16  }
  0x2f   : > { %653 = vsyncadd (%p767_p3), [#allocation5], 4294967280  ;;  %s834_s0 = sand.u32 1, %s668_s10  }
  0x30   : > { %s434_s14 = sshll.u32 %s834_s0, 4  ;;  %s170_s19 = scalar_lea.sflag [#allocation3], %s834_s0 }
  0x31   : > { %s173_s2 = scalar_lea.vmem [#allocation6], %s434_s14 }
  0x32   : > { %655 = dma.done.wait (%p773_p7), %s170_s19, 256  }
  0x33   : > { %657 = vsyncadd (%p773_p7), %s170_s19, 4294967040 }
  0x34   : > { %179 = sfence }
  0x35   : > { %v196_v0 = vld [vmem:[%s173_s2] sm:$0xff]  ;;  %v197_v1 = vld [vmem:[%s173_s2 + $0x8] sm:$0xff]  ;;  %s198_s16 = sld [smem:[#allocation2]]  ;;  %v202_v2 = vlaneseq  ;;  %s697_s21 = smov 16   ;;  %vm235_vm4 = vcmask 1047680   ;;  %v698_v34 = vmov 1  }
  0x36   : > { %s436_s20 = sld [smem:[#allocation2 + $0x1]]  ;;  %v200_v3 = vrot.slane %v196_v0, 7  ;;  %v201_v4 = vrot.slane %v197_v1, 7  ;;  %v207_v5 = vrot.slane %v196_v0, 1  ;;  %v208_v6 = vrot.slane %v197_v1, 1  ;;  %541 = vset.pattern.permute.xlu0 %v698_v34  ;;  %542 = vset.pattern.permute.xlu1 %v698_v34  ;;  %s699_s22 = smov 14  }
  0x37   : > { %v203_v7 = vshrl.u32 %v202_v2, 7  ;;  %v217_v8 = vmul.f32 2.0, %v196_v0  ;;  %v223_v9 = vmul.f32 2.0, %v197_v1  ;;  %v700_v40 = vmov 14   ;;  %s701_s23 = smov 113   ;;  %s195_s27 = scalar_lea.vmem [#allocation7], %s434_s14 }
  0x38   : > { %543 = vset.pattern.permute.xlu2 %v700_v40  ;;  %v259_v46 = vand.u32 127, %v202_v2  ;;  %vm300_vm7 = vcmask 130048   ;;  %s438_s28 = sshll.u32 %s676_s12, 1  ;;  %s439_s29 = sshll.u32 %s680_s13, 3 }
  0x39   : > { %vm204_vm0 = vcmp.lt.s32.totalorder %v203_v7, 1  ;;  %vm209_vm1 = vcmp.lt.s32.totalorder %v203_v7, 7  ;;  %vm215_vm2 = vcmp.eq.s32.totalorder %v203_v7, 0  ;;  %v218_v10 = vperm.slane %v217_v8, 1  ;;  %s315_s4 = sadd.s32 %s439_s29, %s438_s28  ;;  %s942_s8 = sld [smem:[#allocation18_spill]] }
  0x3a   : > { %v206_v11 = vsel %vm204_vm0, %v201_v4, %v200_v3  ;;  %v210_v12 = vsel %vm209_vm1, %v207_v5, %v208_v6  ;;  %v205_v13 = vsel %vm204_vm0, %v200_v3, %v201_v4  ;;  %v211_v14 = vsel %vm209_vm1, %v208_v6, %v207_v5  ;;  %s440_s5 = sshll.u32 %s315_s4, 3  ;;  %s318_s24 = sshll.u32 %s195_s27, 4  ;;  %s319_s24 = int_to_ptr.vmem [resolvable:$true] %s318_s24 }
  0x3b   : > { %v212_v15 = vadd.f32 %v210_v12, %v206_v11  ;;  %v845_v16 = vstv %s198_s16  ;;  %v213_v17 = vadd.f32 %v211_v14, %v205_v13  ;;  %v214_v18 = vadd.s32 8, %v203_v7  ;;  %s304_s12 = scalar_lea.sflag [#allocation4], %s834_s0 }
  0x3c   : > { %v228_v19 = vmul.f32 %v845_v16, %v196_v0  ;;  %v848_v20 = vstv %s436_s20  ;;  %v224_v21 = vperm.slane %v223_v9, 6  ;;  %v229_v26 = vmul.f32 %v845_v16, %v197_v1 }
  0x3d   : > { %v219_v22 = vsel %vm215_vm2, %v218_v10, %v212_v15  ;;  %vm222_vm3 = vcmp.eq.s32.totalorder %v214_v18, 15  ;;  %vm260_vm5 = vcmp.eq.s32.totalorder %v259_v46, 0  ;;  %vm283_vm6 = vcmp.eq.s32.totalorder %v259_v46, 15 }
  0x3e   : > { %v231_v23 = vmul.f32 %v848_v20, %v219_v22  ;;  %v226_v24 = vsel %vm222_vm3, %v224_v21, %v213_v17 }
  0x3f   : > { %v232_v27 = vmul.f32 %v848_v20, %v226_v24  ;;  %s317_s17 = scalar_lea.hbm %s942_s8, %s440_s5  ;;  %s610_s19 = scalar_lea.hbm %s942_s8, 128 }
  0x40   : > { %v233_v25 = vadd.f32 %v231_v23, %v228_v19  ;;  %s320_s25 = sshll.u32 %s317_s17, 4  ;;  %s321_s25 = int_to_ptr.hbm [resolvable:$true] %s320_s25 }
  0x41   : > { %v234_v28 = vadd.f32 %v232_v27, %v229_v26  ;;  %s604_s13 = sshra.s32 %s321_s25, 4  ;;  %s605_s13 = int_to_ptr.hbm [resolvable:$true] %s604_s13 }
  0x42   : > { %236 = vrot.lane.b32.xlu0 %v233_v25, %s697_s21  ;;  %v261_v33 = vmul.f32 2.0, %v233_v25  ;;  %v294_v49 = vmul.f32 %v233_v25, %v845_v16  ;;  %s606_s26 = scalar_lea.hbm %s605_s13, 16  ;;  %p611_p11 = scmp.lt.s32.totalorder %s605_s13, %s942_s8 }
  0x43   : > { %v262_v39 = vmul.f32 2.0, %v234_v28  ;;  %v295_v58 = vmul.f32 %v234_v28, %v845_v16  ;;  %p607_p3 = scmp.ne.s32.totalorder %s605_s13, %s606_s26  ;;  %p612_p12 = scmp.lt.s32.totalorder %s610_s19, %s606_s26 }
  0x45   : > { %p608_p7 = pnand %p607_p3, %p777_p8  ;;  %p613_p13 = por %p612_p12, %p611_p11 }
  0x47   : > { %p609_p10 = pneg %p608_p7 }
  0x49   : > { %p614_p0 = pnand %p613_p13, %p609_p10 }
  0x4a   : > { %239 = vrot.lane.b32.xlu0 %v234_v28, %s697_s21 }
  0x52   : > { %265 = vperm.xlu0 %541, %v261_v33  }
  0x5a   : > { %544 = vset.pattern.permute.xlu0 %v700_v40 }
  0x5b   : > { %289 = vperm.xlu0 %544, %v262_v39  }
  0xb4   : > { %v237_v29 = vpop.permute.xlu0 %236 }
  0xb5   : > { %v238_v30 = vsel %vm235_vm4, %v237_v29, %v233_v25 }
  0xb6   : > { %242 = vrot.lane.b32.xlu1 %v238_v30, %s697_s21 }
  0xbc   : > { %v240_v31 = vpop.permute.xlu0 %239 }
  0xbd   : > { %v241_v32 = vsel %vm235_vm4, %v240_v31, %v234_v28 }
  0xbe   : > { %244 = vrot.lane.b32.xlu1 %v241_v32, %s697_s21 }
  0xc4   : > { %v266_v47 = vpop.permute.xlu0 %265 }
  0xc6   : > { %270 = vperm.xlu1 %542, %v262_v39  }
  0xcd   : > { %v290_v55 = vpop.permute.xlu0 %289 }
 0x128   : > { %v243_v35 = vpop.permute.xlu1 %242 }
 0x129   : > { %v246_v36 = vsel %vm235_vm4, %v243_v35, %v233_v25 }
 0x12a   : > { %250 = vrot.lane.b32.xlu2 %v246_v36, %s699_s22 }
 0x130   : > { %v245_v37 = vpop.permute.xlu1 %244 }
 0x131   : > { %v247_v38 = vsel %vm235_vm4, %v245_v37, %v234_v28 }
 0x132   : > { %252 = vrot.lane.b32.xlu2 %v247_v38, %s699_s22 }
 0x138   : > { %v271_v54 = vpop.permute.xlu1 %270 }
 0x184   : > { %v251_v41 = vpop.permute.xlu2 %250 }
 0x185   : > { %v256_v42 = vadd.f32 %v251_v41, %v246_v36 }
 0x187   : > { %275 = vrot.lane.b32.xlu2 %v256_v42, %s701_s23 }
 0x18c   : > { %v253_v43 = vpop.permute.xlu2 %252 }
 0x18d   : > { %v257_v44 = vadd.f32 %v253_v43, %v247_v38 }
 0x18f   : > { %285 = vperm.xlu2 %543, %v261_v33   ;;  %277 = vrot.lane.b32.xlu1 %v257_v44, %s701_s23 }
 0x1e1   : > { %v276_v45 = vpop.permute.xlu2 %275 }
 0x1e2   : > { %v281_v48 = vsel %vm260_vm5, %v266_v47, %v276_v45 }
 0x1e9   : > { %v286_v50 = vpop.permute.xlu2 %285 }
 0x1ea   : > { %v292_v51 = vsel %vm283_vm6, %v286_v50, %v281_v48 }
 0x1eb   : > { %v296_v52 = vmul.f32 %v292_v51, %v848_v20 }
 0x1ed   : > { %v298_v53 = vadd.f32 %v296_v52, %v294_v49 }
 0x1ef   : > { %301 = vst.msk [vmem:[%s195_s27] sm:$0xff] %vm300_vm7, %v298_v53 }
 0x201   : > { %v278_v56 = vpop.permute.xlu1 %277 }
 0x202   : > { %v282_v57 = vsel %vm260_vm5, %v271_v54, %v278_v56 }
 0x203   : > { %v293_v59 = vsel %vm283_vm6, %v290_v55, %v282_v57 }
 0x204   : > { %v297_v60 = vmul.f32 %v293_v59, %v848_v20 }
 0x206   : > { %v299_v61 = vadd.f32 %v297_v60, %v295_v58 }
 0x208   : > { %302 = vst.msk [vmem:[%s195_s27 + $0x8] sm:$0xff] %vm300_vm7, %v299_v61 }
 0x209   : > { %617 = shalt.err (!%p614_p0)
}
 0x20a   : > { %s702_s0 = smov 128   ;;  %s703_s20 = smov 8  }
 0x20b   : > { %449 = dma.vmem_to_hbm [thread:$0]  (%p777_p8), %s319_s24, 256, %s321_s25, %s304_s12, %s702_s0, %s702_s0, %s703_s20  }
 0x20c PF: > { %s944_s21 = sld [smem:[#allocation13_spill]] }
 0x20d   : > { %s945_s22 = sld [smem:[#allocation11_spill]] }
 0x212   : > { %p466_p1 = scmp.ge.s32.totalorder %s944_s21, 2 }
 0x213   : > { %s335_s27 = sand.u32 1, %s945_s22  }
 0x214   : > { %p460_p2 = pnand %p466_p1, %p781_p9  ;;  %s336_s28 = scalar_lea.sflag [#allocation4], %s335_s27 }
 0x216   : > { %p461_p4 = pneg %p460_p2 }
 0x218   : > { %659 = dma.done.wait (%p461_p4), %s336_s28, 256  }
 0x219   : > { %661 = vsyncadd (%p461_p4), %s336_s28, 4294967040  ;;  %s19_s16 = sadd.s32 1, %s944_s21   ;;  %s947_s29 = smov %s823_s9 }
 0x21a   : > { %p16_p5 = scmp.ge.s32.totalorder %s19_s16, 10   ;;  %s948_s12 = sld [smem:[#allocation12_spill]] }
 0x21b   : > { %s949_s14 = sld [smem:[#allocation16_spill]]  ;;  %s950_s9 = smov %s668_s10 }
 0x21c   : > { %s951_s10 = smov %s672_s11  ;;  %s952_s11 = smov %s947_s29 }
 0x21d   : > { %s953_s13 = smov %s688_s15  ;;  %s954_s15 = smov %s960_s3 }
 0x21e   :  { %18 = sbr.rel (!%p16_p5) target bundleno = 11 (0xb), region = 78 }
 0x223   :  { %342 = vsyncpa [#allocation3], 1 }
 0x224   :  { %344 = vsyncpa [#allocation3 + $0x1], 1 }
 0x225   :  { %345 = vsyncpa [#allocation4], 1 }
 0x226   :  { %347 = vsyncpa [#allocation4 + $0x1], 1 }
 0x227   :  { %348 = vsyncpa [#allocation5], 1 }
 0x228   :  { %350 = vsyncpa [#allocation5 + $0x1], 1 }

</bundles_post_ra>
